<compile_context>
chip_gen: v6e
topology: v6e:2x2x1
jax: 0.10.0
libtpu: 0.0.40
codegen_flags: <defaults>
</compile_context>

<pallas_src>
import functools

import jax
import jax.numpy as jnp
from jax.experimental import pallas as pl
from jax.experimental.pallas import tpu as pltpu

MIDDLE = 64            # self.middle_neurons
INPUT_SIZE = 128       # input_size
EXTRA = 18             # input_shape_extra[-1]  (>= 18 so the hand-set columns exist)
FUSED = 2 * MIDDLE     # 128-wide fused advantage|state slab
BN_EPS = 1e-5
STATS_ROWS = 8         # per-tile stats block padded to a full (8, 128) tile
MAX_TILE_B = 1024      # batch tile cap (multiple of 8); a few MiB of VMEM


# --------------------------------------------------------------------------
# Kernels
# --------------------------------------------------------------------------

def _z_tile(state_ref, neigh_ref, w1_ref, wmid_ref, b1, b_mid):
    """Fused pre-BN slab for one batch tile: (TILE_B, 128) f32."""
    # l1: Linear(128 -> 64) + ReLU  (bf16 matmul, f32 accumulate)
    h = jnp.dot(state_ref[...].astype(jnp.bfloat16), w1_ref[...],
                preferred_element_type=jnp.float32) + b1
    h = jnp.maximum(h, 0.0)                                    # (TILE_B, 64)
    # first layer of both branches, concat-free split matmul, 128-lane dense
    wmid = wmid_ref[...]                                       # (82, 128) bf16
    z = (jnp.dot(h.astype(jnp.bfloat16), wmid[:MIDDLE, :],
                 preferred_element_type=jnp.float32)
         + jnp.dot(neigh_ref[...].astype(jnp.bfloat16), wmid[MIDDLE:, :],
                   preferred_element_type=jnp.float32)
         + b_mid)                                              # (TILE_B, 128)
    return z


def _stats_kernel(state_ref, neigh_ref, w1_ref, wmid_ref, vec_ref, stats_ref,
                  *, tile_b, batch, need_mask):
    """Pass 1: per-tile partial sum / sumsq of z (rows beyond `batch` masked)."""
    vec = vec_ref[...]
    b1 = vec[0:1, :MIDDLE]
    b_mid = vec[1:2, :]
    z = _z_tile(state_ref, neigh_ref, w1_ref, wmid_ref, b1, b_mid)
    if need_mask:
        row = (pl.program_id(0) * tile_b
               + jax.lax.broadcasted_iota(jnp.int32, (tile_b, FUSED), 0))
        z = jnp.where(row < batch, z, 0.0)
    s1 = jnp.sum(z, axis=0, keepdims=True)        # (1, 128)
    s2 = jnp.sum(z * z, axis=0, keepdims=True)    # (1, 128)
    stats_ref[...] = jnp.concatenate(
        [s1, s2, jnp.zeros((STATS_ROWS - 2, FUSED), jnp.float32)], axis=0)


def _fwd_kernel(state_ref, neigh_ref, w1_ref, wmid_ref, wfold_ref, vec_ref,
                bn_ref, out_ref):
    """Pass 2: recompute z, apply folded BN + ReLU, folded dueling head."""
    vec = vec_ref[...]
    b1 = vec[0:1, :MIDDLE]
    b_mid = vec[1:2, :]
    bfold = vec[0:1, MIDDLE:MIDDLE + 4]           # folded head bias (1, 4)
    z = _z_tile(state_ref, neigh_ref, w1_ref, wmid_ref, b1, b_mid)
    bn = bn_ref[...]                              # (2, 128): [inv; shift]
    zn = jnp.maximum(z * bn[0:1, :] + bn[1:2, :], 0.0)
    out_ref[...] = jnp.dot(zn.astype(jnp.bfloat16), wfold_ref[...],
                           preferred_element_type=jnp.float32) + bfold


# --------------------------------------------------------------------------
# Wrapper: batch tiling + two-pass BatchNorm
# --------------------------------------------------------------------------

def _round_up(x, m):
    return (x + m - 1) // m * m


def qvalue_forward(state, neigh, packed, *, max_tile_b=MAX_TILE_B):
    w1, wmid, wfold, vec = packed["w1"], packed["wmid"], packed["wfold"], packed["vec"]
    gamma, beta = packed["gamma"], packed["beta"]

    batch = state.shape[0]
    tile_b = min(max_tile_b, _round_up(batch, 8))
    b_pad = _round_up(batch, tile_b)
    if b_pad != batch:
        state = jnp.pad(state, ((0, b_pad - batch), (0, 0)))
        neigh = jnp.pad(neigh, ((0, b_pad - batch), (0, 0)))
    num_tiles = b_pad // tile_b

    cparams = pltpu.CompilerParams(
        dimension_semantics=("parallel",),
        vmem_limit_bytes=32 * 1024 * 1024,
    )

    const = lambda i: (0, 0)
    tile_specs = [
        pl.BlockSpec((tile_b, INPUT_SIZE), lambda i: (i, 0)),   # state
        pl.BlockSpec((tile_b, EXTRA), lambda i: (i, 0)),        # neighbours
    ]
    w1_spec = pl.BlockSpec((INPUT_SIZE, MIDDLE), const)
    wmid_spec = pl.BlockSpec((MIDDLE + EXTRA, FUSED), const)
    vec_spec = pl.BlockSpec((2, FUSED), const)

    # ---- pass 1: per-tile partial (sum, sumsq) of the pre-BN slab ----
    stats_kernel = functools.partial(
        _stats_kernel, tile_b=tile_b, batch=batch, need_mask=(b_pad != batch))
    partial_stats = pl.pallas_call(
        stats_kernel,
        out_shape=jax.ShapeDtypeStruct((num_tiles * STATS_ROWS, FUSED), jnp.float32),
        grid=(num_tiles,),
        in_specs=tile_specs + [w1_spec, wmid_spec, vec_spec],
        out_specs=pl.BlockSpec((STATS_ROWS, FUSED), lambda i: (i, 0)),
        compiler_params=cparams,
    )(state, neigh, w1, wmid, vec)

    # ---- global BN stats + folded scale/shift (tiny XLA ops on (1,128)) ----
    p = partial_stats.reshape(num_tiles, STATS_ROWS, FUSED).sum(axis=0)
    mean = p[0:1] / batch
    var = jnp.maximum(p[1:2] / batch - mean * mean, 0.0)
    inv = jax.lax.rsqrt(var + BN_EPS) * gamma
    shift = beta - mean * inv
    bn = jnp.concatenate([inv, shift], axis=0)                  # (2, 128)

    # ---- pass 2: normalize + folded dueling head, per batch tile ----
    out = pl.pallas_call(
        _fwd_kernel,
        out_shape=jax.ShapeDtypeStruct((b_pad, 4), jnp.float32),
        grid=(num_tiles,),
        in_specs=tile_specs + [
            w1_spec, wmid_spec,
            pl.BlockSpec((FUSED, 4), const),                    # wfold
            vec_spec,
            pl.BlockSpec((2, FUSED), const),                    # bn (inv/shift)
        ],
        out_specs=pl.BlockSpec((tile_b, 4), lambda i: (i, 0)),
        compiler_params=cparams,
    )(state, neigh, w1, wmid, wfold, vec, bn)
    return out[:batch]


# --------------------------------------------------------------------------
# Parameter construction (deterministic torch-style init) and packing
# --------------------------------------------------------------------------

def _linear_params(key, fan_in, fan_out):
    """torch Linear default init (uniform +/- 1/sqrt(fan_in)), stored (in, out)."""
    kw, kb = jax.random.split(key)
    bound = 1.0 / float(fan_in) ** 0.5
    w = jax.random.uniform(kw, (fan_in, fan_out), jnp.float32, -bound, bound)
    b = jax.random.uniform(kb, (1, fan_out), jnp.float32, -bound, bound)
    return w, b


def make_params(key):
    """Unpacked params mirroring QValueModule.__init__ (weights stored (in, out))."""
    k1, k2, k3, k4, k5 = jax.random.split(key, 5)
    D = MIDDLE + EXTRA  # 82

    w1, b1 = _linear_params(k1, INPUT_SIZE, MIDDLE)

    # advantage_l[0]: Linear(82 -> 64) with the hand-set entries from __init__.
    # torch weight is (out, in); ours is (in, out): weight[:, c] -> wa1[c, :],
    # weight[r, c] -> wa1[c, r].
    wa1, ba1 = _linear_params(k2, D, MIDDLE)
    for i in range(4):
        wa1 = wa1.at[D - 3 - i * 4, :].set(-0.1)
        wa1 = wa1.at[D - 1 - i * 4, :].set(0.1)
    for i in range(4):
        wa1 = wa1.at[D - 17, i].set(0.01 if i in (2, 3) else -0.01)
        wa1 = wa1.at[D - 18, i].set(0.01 if i in (0, 1) else -0.01)

    wa2, ba2 = _linear_params(k3, MIDDLE, 4)       # advantage_l[3]
    ws1, bs1 = _linear_params(k4, D, MIDDLE)       # state_l[0]
    ws2, bs2 = _linear_params(k5, MIDDLE, 1)       # state_l[3]

    # BatchNorm1d affine params (torch default: weight=1, bias=0)
    ga, bta = jnp.ones((1, MIDDLE), jnp.float32), jnp.zeros((1, MIDDLE), jnp.float32)
    gs, bts = jnp.ones((1, MIDDLE), jnp.float32), jnp.zeros((1, MIDDLE), jnp.float32)

    return (w1, b1, wa1, ba1, ga, bta, wa2, ba2, ws1, bs1, gs, bts, ws2, bs2)


def pack_params(params):
    """Pack tensors for the kernels; folds the dueling combine into the head."""
    (w1, b1, wa1, ba1, ga, bta, wa2, ba2, ws1, bs1, gs, bts, ws2, bs2) = params

    w1_p = w1.astype(jnp.bfloat16)                                     # (128, 64)
    wmid = jnp.concatenate([wa1, ws1], axis=1).astype(jnp.bfloat16)    # (82, 128)

    # out = sv + adv - mean(adv) is linear in zn -> fold into one (128,4) head:
    #   rows 0:64  : Wa2 - column-mean(Wa2)         (advantage part, centered)
    #   rows 64:128: Ws2 broadcast to all 4 columns (state-value part)
    #   bias       : bs2 + (ba2 - mean(ba2))
    wa2c = wa2 - jnp.mean(wa2, axis=1, keepdims=True)                  # (64, 4)
    wfold = jnp.concatenate(
        [wa2c, jnp.broadcast_to(ws2, (MIDDLE, 4))], axis=0
    ).astype(jnp.bfloat16)                                             # (128, 4)
    bfold = (ba2 - jnp.mean(ba2, axis=1, keepdims=True)) + bs2         # (1, 4)

    vec = jnp.zeros((2, FUSED), jnp.float32)
    vec = vec.at[0, :MIDDLE].set(b1[0])                 # l1 bias
    vec = vec.at[0, MIDDLE:MIDDLE + 4].set(bfold[0])    # folded head bias
    vec = vec.at[1, :].set(jnp.concatenate([ba1, bs1], axis=1)[0])     # [ba1|bs1]

    return dict(
        w1=w1_p, wmid=wmid, wfold=wfold, vec=vec,
        gamma=jnp.concatenate([ga, gs], axis=1),        # used outside the kernel
        beta=jnp.concatenate([bta, bts], axis=1),
    )


# --------------------------------------------------------------------------
# Pure-JAX reference (structurally faithful to the PyTorch module; big matmuls
# use the same bf16-operand / f32-accumulate precision as the kernels).
# --------------------------------------------------------------------------

def qvalue_reference(state, neigh, params):
    (w1, b1, wa1, ba1, ga, bta, wa2, ba2, ws1, bs1, gs, bts, ws2, bs2) = params

    def mm(x, w):
        return jnp.dot(x.astype(jnp.bfloat16), w.astype(jnp.bfloat16),
                       preferred_element_type=jnp.float32)

    def bn(v, g, bt):
        m = jnp.mean(v, axis=0, keepdims=True)
        var = jnp.mean((v - m) ** 2, axis=0, keepdims=True)   # biased var (torch BN)
        return (v - m) * jax.lax.rsqrt(var + BN_EPS) * g + bt

    h = jnp.maximum(mm(state, w1) + b1, 0.0)
    x = jnp.concatenate([h, neigh], axis=-1)
    adv = mm(jnp.maximum(bn(mm(x, wa1) + ba1, ga, bta), 0.0), wa2) + ba2
    sv = mm(jnp.maximum(bn(mm(x, ws1) + bs1, gs, bts), 0.0), ws2) + bs2
    adv = adv - jnp.mean(adv, axis=1, keepdims=True)
    return sv + adv


if __name__ == "__main__":
    key = jax.random.PRNGKey(0)
    kp, ks, kn, ks2, kn2 = jax.random.split(key, 5)

    params = make_params(kp)
    packed = pack_params(params)

    # Single-tile case (B = 8).
    B = 8
    state = jax.random.normal(ks, (B, INPUT_SIZE), jnp.float32)
    neigh = jax.random.normal(kn, (B, EXTRA), jnp.float32)
    out = jax.block_until_ready(qvalue_forward(state, neigh, packed))
    ref = jax.block_until_ready(qvalue_reference(state, neigh, params))
    assert out.shape == (B, 4)
    assert jnp.allclose(out, ref, rtol=1e-2, atol=1e-2), "mismatch vs reference (B=8)"

    # Multi-tile + ragged batch: exercises the two-pass global BatchNorm,
    # batch padding/masking and the 'parallel' batch grid.
    B2 = 20
    state2 = jax.random.normal(ks2, (B2, INPUT_SIZE), jnp.float32)
    neigh2 = jax.random.normal(kn2, (B2, EXTRA), jnp.float32)
    out2 = jax.block_until_ready(qvalue_forward(state2, neigh2, packed, max_tile_b=8))
    ref2 = jax.block_until_ready(qvalue_reference(state2, neigh2, params))
    assert out2.shape == (B2, 4)
    assert jnp.allclose(out2, ref2, rtol=1e-2, atol=1e-2), "mismatch vs reference (B=20, tiled)"

    print("KERNEL_OK")
</pallas_src>

<mosaic_0001>
module attributes {stable_mosaic.version = 11 : i64} {
  func.func @_stats_kernel(%arg0: i32, %arg1: memref<8x128xf32, #tpu.memory_space<vmem>>, %arg2: memref<8x18xf32, #tpu.memory_space<vmem>>, %arg3: memref<128x64xbf16, #tpu.memory_space<vmem>>, %arg4: memref<82x128xbf16, #tpu.memory_space<vmem>>, %arg5: memref<2x128xf32, #tpu.memory_space<vmem>>, %arg6: memref<8x128xf32, #tpu.memory_space<vmem>>) attributes {dimension_semantics = [#tpu.dimension_semantics<parallel>], iteration_bounds = array<i64: 1>, scalar_prefetch = 0 : i64, scratch_operands = 0 : i64, tpu.core_type = #tpu.core_type<tc>, window_params = [{transform_indices = @transform_0, window_bounds = array<i64: 8, 128>}, {transform_indices = @transform_1, window_bounds = array<i64: 8, 18>}, {pipeline_mode = #tpu.pipeline_mode<synchronous>, transform_indices = @transform_2, window_bounds = array<i64: 128, 64>}, {pipeline_mode = #tpu.pipeline_mode<synchronous>, transform_indices = @transform_3, window_bounds = array<i64: 82, 128>}, {pipeline_mode = #tpu.pipeline_mode<synchronous>, transform_indices = @transform_4, window_bounds = array<i64: 2, 128>}, {transform_indices = @transform_5, window_bounds = array<i64: 8, 128>}]} {
    %c0 = arith.constant 0 : index
    %c0_0 = arith.constant 0 : index
    %0 = vector.load %arg5[%c0, %c0_0] : memref<2x128xf32, #tpu.memory_space<vmem>>, vector<2x128xf32>
    %1 = vector.extract_strided_slice %0 {offsets = [0, 0], sizes = [1, 64], strides = [1, 1]} : vector<2x128xf32> to vector<1x64xf32>
    %2 = vector.extract_strided_slice %0 {offsets = [1, 0], sizes = [1, 128], strides = [1, 1]} : vector<2x128xf32> to vector<1x128xf32>
    %c0_1 = arith.constant 0 : index
    %c0_2 = arith.constant 0 : index
    %3 = vector.load %arg1[%c0_1, %c0_2] : memref<8x128xf32, #tpu.memory_space<vmem>>, vector<8x128xf32>
    %4 = arith.truncf %3 : vector<8x128xf32> to vector<8x128xbf16>
    %c0_3 = arith.constant 0 : index
    %c0_4 = arith.constant 0 : index
    %5 = vector.load %arg3[%c0_3, %c0_4] : memref<128x64xbf16, #tpu.memory_space<vmem>>, vector<128x64xbf16>
    %cst = arith.constant dense<0.000000e+00> : vector<8x64xf32>
    %6 = tpu.matmul %4, %5, %cst {dimension_numbers = #tpu.dot_dimension_numbers<[1], [0], [0], [1], [0, 0, 1, 1], [], []>} : vector<8x128xbf16>, vector<128x64xbf16>, vector<8x64xf32> -> vector<8x64xf32>
    %7 = vector.broadcast %1 : vector<1x64xf32> to vector<8x64xf32>
    %8 = arith.addf %6, %7 : vector<8x64xf32>
    %cst_5 = arith.constant 0.000000e+00 : f32
    %9 = vector.broadcast %cst_5 : f32 to vector<8x64xf32>
    %10 = arith.maximumf %8, %9 : vector<8x64xf32>
    %c0_6 = arith.constant 0 : index
    %c0_7 = arith.constant 0 : index
    %11 = vector.load %arg4[%c0_6, %c0_7] : memref<82x128xbf16, #tpu.memory_space<vmem>>, vector<82x128xbf16>
    %12 = arith.truncf %10 : vector<8x64xf32> to vector<8x64xbf16>
    %13 = vector.extract_strided_slice %11 {offsets = [0, 0], sizes = [64, 128], strides = [1, 1]} : vector<82x128xbf16> to vector<64x128xbf16>
    %cst_8 = arith.constant dense<0.000000e+00> : vector<8x128xf32>
    %14 = tpu.matmul %12, %13, %cst_8 {dimension_numbers = #tpu.dot_dimension_numbers<[1], [0], [0], [1], [0, 0, 1, 1], [], []>} : vector<8x64xbf16>, vector<64x128xbf16>, vector<8x128xf32> -> vector<8x128xf32>
    %c0_9 = arith.constant 0 : index
    %c0_10 = arith.constant 0 : index
    %15 = vector.load %arg2[%c0_9, %c0_10] : memref<8x18xf32, #tpu.memory_space<vmem>>, vector<8x18xf32>
    %16 = arith.truncf %15 : vector<8x18xf32> to vector<8x18xbf16>
    %17 = vector.extract_strided_slice %11 {offsets = [64, 0], sizes = [18, 128], strides = [1, 1]} : vector<82x128xbf16> to vector<18x128xbf16>
    %cst_11 = arith.constant dense<0.000000e+00> : vector<8x128xf32>
    %18 = tpu.matmul %16, %17, %cst_11 {dimension_numbers = #tpu.dot_dimension_numbers<[1], [0], [0], [1], [0, 0, 1, 1], [], []>} : vector<8x18xbf16>, vector<18x128xbf16>, vector<8x128xf32> -> vector<8x128xf32>
    %19 = arith.addf %14, %18 : vector<8x128xf32>
    %20 = vector.broadcast %2 : vector<1x128xf32> to vector<8x128xf32>
    %21 = arith.addf %19, %20 : vector<8x128xf32>
    %cst_12 = arith.constant dense<0.000000e+00> : vector<128xf32>
    %22 = vector.multi_reduction <add>, %21, %cst_12 [0] : vector<8x128xf32> to vector<128xf32>
    %23 = vector.shape_cast %22 : vector<128xf32> to vector<1x128xf32>
    %24 = arith.mulf %21, %21 : vector<8x128xf32>
    %cst_13 = arith.constant dense<0.000000e+00> : vector<128xf32>
    %25 = vector.multi_reduction <add>, %24, %cst_13 [0] : vector<8x128xf32> to vector<128xf32>
    %26 = vector.shape_cast %25 : vector<128xf32> to vector<1x128xf32>
    %cst_14 = arith.constant 0.000000e+00 : f32
    %27 = vector.broadcast %cst_14 : f32 to vector<6x128xf32>
    %28 = tpu.concatenate %23, %26, %27 in 0 : vector<1x128xf32>, vector<1x128xf32>, vector<6x128xf32> -> vector<8x128xf32>
    %c0_15 = arith.constant 0 : index
    %c0_16 = arith.constant 0 : index
    %29 = vector.load %arg6[%c0_15, %c0_16] : memref<8x128xf32, #tpu.memory_space<vmem>>, vector<8x128xf32>
    tpu.vector_store %arg6[%c0_15, %c0_16], %28 {strides = array<i32>} : memref<8x128xf32, #tpu.memory_space<vmem>>, vector<8x128xf32>,
    return
  }
  func.func @transform_0(%arg0: i32) -> (i32, i32) {
    %c0_i32 = arith.constant 0 : i32
    %c0_i32_0 = arith.constant 0 : i32
    return %arg0, %c0_i32 : i32, i32
  }
  func.func @transform_1(%arg0: i32) -> (i32, i32) {
    %c0_i32 = arith.constant 0 : i32
    %c0_i32_0 = arith.constant 0 : i32
    return %arg0, %c0_i32 : i32, i32
  }
  func.func @transform_2(%arg0: i32) -> (i32, i32) {
    %c0_i32 = arith.constant 0 : i32
    %c0_i32_0 = arith.constant 0 : i32
    %c0_i32_1 = arith.constant 0 : i32
    return %c0_i32, %c0_i32_0 : i32, i32
  }
  func.func @transform_3(%arg0: i32) -> (i32, i32) {
    %c0_i32 = arith.constant 0 : i32
    %c0_i32_0 = arith.constant 0 : i32
    %c0_i32_1 = arith.constant 0 : i32
    return %c0_i32, %c0_i32_0 : i32, i32
  }
  func.func @transform_4(%arg0: i32) -> (i32, i32) {
    %c0_i32 = arith.constant 0 : i32
    %c0_i32_0 = arith.constant 0 : i32
    %c0_i32_1 = arith.constant 0 : i32
    return %c0_i32, %c0_i32_0 : i32, i32
  }
  func.func @transform_5(%arg0: i32) -> (i32, i32) {
    %c0_i32 = arith.constant 0 : i32
    %c0_i32_0 = arith.constant 0 : i32
    return %arg0, %c0_i32 : i32, i32
  }
}

</mosaic_0001>

<bundles_post_ra>
// kernel: tpu_custom_call.1
= control target key start
LH: loop header
LB: loop body
LE: loop exit
PB: predicated region body
PF: predicated region fallthrough
CT: control target
= control target key end

     0   :  { %v421_v1 = vmov 0.0   ;;  %vm422_vm0 = vmmov 0   ;;  %vm161_vm1 = vcmask 1040384   ;;  %s513_s0 = inlined_call_operand.vmem [shape: f32[8,128], index: 0, kind: input, shape index: {}]   ;;  %s514_s1 = inlined_call_operand.vmem [shape: f32[8,18], index: 1, kind: input, shape index: {}]   ;;  %s515_s2 = inlined_call_operand.vmem [shape: bf16[128,64], index: 2, kind: input, shape index: {}]   ;;  %s516_s3 = inlined_call_operand.vmem [shape: bf16[82,128], index: 3, kind: input, shape index: {}]   ;;  %s517_s4 = inlined_call_operand.vmem [shape: f32[2,128], index: 4, kind: input, shape index: {}]   ;;  %s518_s5 = inlined_call_operand.hbm [shape: f32[8,128], index: 5, kind: output, shape index: {}]  }
   0x1   :  { %v385_v0 = vld [vmem:[%s515_s2 + $0x38] sm:$0xff]   ;;  %342 = vmatprep.subr.bf16.mxu0 %v421_v1  ;;  %362 = vmatprep.subr.bf16.mxu1 %v421_v1  ;;  %v386_v2 = vld [vmem:[%s515_s2 + $0x30] sm:$0xff]   ;;  %v387_v3 = vld [vmem:[%s515_s2 + $0x28] sm:$0xff]  }
   0x2   :  { %343 = vmatpush3.bf16.msra.mxu0 %v385_v0  ;;  %358 = vmatprep.mubr.msk.bf16.mxu0 %vm422_vm0, %v421_v1  ;;  %v393_v4 = vld [vmem:[%s516_s3 + $0x28] ss:$0 sps:$4 sm:$0x11]   ;;  %v388_v5 = vld [vmem:[%s515_s2 + $0x20] sm:$0xff]   ;;  %v389_v9 = vld [vmem:[%s515_s2 + $0x18] sm:$0xff]  }
   0x3   :  { %344 = vmatprep.subr.bf16.mxu0 %v421_v1  ;;  %366 = vmatprep.mubr.msk.bf16.mxu1 %vm422_vm0, %v421_v1  ;;  %v163_v6 = vsel %vm161_vm1, %v393_v4, 0  ;;  %v394_v7 = vld [vmem:[%s516_s3 + $0x20] sm:$0xff]  }
   0x4   :  { %363 = vmatpush3.bf16.msra.mxu1 %v163_v6  ;;  %v146_v8 = vld [vmem:[%s514_s1] sm:$0xff] }
   0x5   :  { %364 = vmatprep.subr.bf16.mxu1 %v421_v1  ;;  %v147_v10 = vpack.c.bf16 %v146_v8, %v146_v8 }
   0x6   :  { %345 = vmatpush3.bf16.msra.mxu0 %v386_v2 }
   0x7   :  { %346 = vmatprep.subr.bf16.mxu0 %v421_v1 }
   0xa   :  { %347 = vmatpush3.bf16.msra.mxu0 %v387_v3 }
   0xb   :  { %348 = vmatprep.subr.bf16.mxu0 %v421_v1 }
   0xe   :  { %349 = vmatpush3.bf16.msra.mxu0 %v388_v5 }
   0xf   :  { %10 = vsyncpa [#allocation3], 0  ;;  %350 = vmatprep.subr.bf16.mxu0 %v421_v1  ;;  %365 = vmatpush3.bf16.msra.mxu1 %v394_v7  ;;  %vm157_vm2 = vcmask 146432   ;;  %v395_v11 = vld [vmem:[%s516_s3 + $0x18] sm:$0xff]   ;;  %v390_v12 = vld [vmem:[%s515_s2 + $0x10] sm:$0xff]   ;;  %v41_v20 = vlaneseq  ;;  %vm229_vm3 = vcmask 523264  }
  0x10   :  { %370 = vmatprep.subr.bf16.mxu1 %v421_v1  ;;  %v396_v13 = vld [vmem:[%s516_s3 + $0x10] sm:$0xff]   ;;  %v391_v14 = vld [vmem:[%s515_s2 + $0x8] sm:$0xff]   ;;  %v392_v15 = vld [vmem:[%s515_s2] sm:$0xff]   ;;  %vm292_vm4 = vcmask 1041408  }
  0x11   :  { %v23_v16 = vld [vmem:[%s513_s0] sm:$0xff]  ;;  %v397_v18 = vld [vmem:[%s516_s3 + $0x8] sm:$0xff]   ;;  %v42_v23 = vshrl.u32 %v41_v20, 7 }
  0x12   :  { %351 = vmatpush3.bf16.msra.mxu0 %v389_v9  ;;  %367 = vmatmul.mubr.msk.bf16.vlgmr.msra.gmra.mxu1 %vm157_vm2, %v147_v10  ;;  %v24_v17 = vpack.c.bf16 %v23_v16, %v23_v16  ;;  %v398_v19 = vld [vmem:[%s516_s3] sm:$0xff]   ;;  %s423_s3 = smov [#allocation2]  }
  0x13   :  { %352 = vmatprep.subr.bf16.mxu0 %v421_v1  ;;  %371 = vmatpush3.bf16.msra.mxu1 %v395_v11  ;;  %v43_v26 = vsub.s32 0, %v42_v23  ;;  %v22_v27 = vld [vmem:[%s517_s4] sm:$0x3]  ;;  %v275_v36 = vsub.s32 1, %v42_v23  ;;  %s301_s4 = sshll.u32 %s423_s3, 4  ;;  %s302_s4 = int_to_ptr.vmem [resolvable:$true] %s301_s4 }
  0x14   :  { %372 = vmatprep.subr.bf16.mxu1 %v421_v1  ;;  %378 = vmatprep.mubr.msk.bf16.mxu1 %vm422_vm0, %v421_v1  ;;  %s399_s24 = scalar_lea.vmem %s302_s4, 128  ;;  %p404_p1 = scmp.lt.s32.totalorder %s302_s4, %s302_s4 }
  0x15   :  { %v44_v28 = vrot.slane %v22_v27, %v43_v26  ;;  %v276_v37 = vrot.slane %v22_v27, %v275_v36  ;;  %p400_p0 = scmp.ne.s32.totalorder %s302_s4, %s399_s24  ;;  %p405_p2 = scmp.lt.s32.totalorder %s399_s24, %s399_s24 }
  0x16   :  { %353 = vmatpush3.bf16.msra.mxu0 %v390_v12 }
  0x17   :  { %354 = vmatprep.subr.bf16.mxu0 %v421_v1  ;;  %373 = vmatpush3.bf16.msra.mxu1 %v396_v13  ;;  %p406_p3 = por %p405_p2, %p404_p1 }
  0x18   :  { %374 = vmatprep.subr.bf16.mxu1 %v421_v1 }
  0x19   :  { %p407_p4 = pnand %p406_p3, %p400_p0 }
  0x1a   :  { %355 = vmatpush3.bf16.msra.mxu0 %v391_v14 }
  0x1b   :  { %356 = vmatprep.subr.bf16.mxu0 %v421_v1  ;;  %375 = vmatpush3.bf16.msra.mxu1 %v397_v18 }
  0x1c   :  { %376 = vmatprep.subr.bf16.mxu1 %v421_v1 }
  0x1e   :  { %357 = vmatpush3.bf16.msra.mxu0 %v392_v15 }
  0x1f   :  { %377 = vmatpush3.bf16.msra.mxu1 %v398_v19 }
  0x21   :  { %359 = vmatmul.mubr.bf16.vlgmr.msra.gmra.mxu0 %v24_v17 }
  0xd2   :  { %v199_v21 = vpop.f32.mrf.mxu1 }
  0xd4   :  { %v368_v22 = vpop.f32.mrf.mxu1 }
  0xd6   :  { %v202_v24 = vpop.f32.mrf.mxu1 }
  0xd8   :  { %v369_v25 = vpop.f32.mrf.mxu1 }
  0xe1   :  { %v127_v29 = vpop.f32.mrf.mxu0 }
  0xe2   :  { %v128_v30 = vadd.f32 %v127_v29, %v44_v28 }
  0xe3   :  { %v360_v31 = vpop.f32.mrf.mxu0 }
  0xe4   :  { %v133_v32 = vmax.f32 %v128_v30, 0.0 }
  0xe5   :  { %v130_v33 = vpop.f32.mrf.mxu0 }
  0xe6   :  { %v145_v34 = vpack.c.bf16 %v133_v32, %v133_v32 }
  0xe7   :  { %v361_v35 = vpop.f32.mrf.mxu0 }
  0xe8   :  { %379 = vmatmul.mubr.msk.bf16.vlgmr.msra.gmra.mxu1 %vm229_vm3, %v145_v34 }
 0x1a8   :  { %v267_v38 = vpop.f32.mrf.mxu1 }
 0x1a9   :  { %v268_v39 = vadd.f32 %v267_v38, %v199_v21 }
 0x1aa   :  { %v380_v40 = vpop.f32.mrf.mxu1 }
 0x1ab   :  { %v277_v41 = vadd.f32 %v276_v37, %v268_v39 }
 0x1ac   :  { %v270_v42 = vpop.f32.mrf.mxu1 }
 0x1ad   :  { %v278_v43 = vrot.slane %v277_v41, 4  ;;  %v284_v44 = vmul.f32 %v277_v41, %v277_v41 }
 0x1ae   :  { %v381_v45 = vpop.f32.mrf.mxu1 }
 0x1af   :  { %v279_v46 = vadd.f32 %v278_v43, %v277_v41  ;;  %v285_v47 = vrot.slane %v284_v44, 4 }
 0x1b1   :  { %v280_v48 = vrot.slane %v279_v46, 2  ;;  %v286_v49 = vadd.f32 %v285_v47, %v284_v44 }
 0x1b3   :  { %v281_v50 = vadd.f32 %v280_v48, %v279_v46  ;;  %v287_v51 = vrot.slane %v286_v49, 2 }
 0x1b5   :  { %v282_v52 = vrot.slane %v281_v50, 1  ;;  %v288_v53 = vadd.f32 %v287_v51, %v286_v49 }
 0x1b7   :  { %v289_v54 = vrot.slane %v288_v53, 1  ;;  %v283_v55 = vadd.f32 %v282_v52, %v281_v50 }
 0x1b9   :  { %v290_v56 = vadd.f32 %v289_v54, %v288_v53 }
 0x1bb   :  { %v291_v57 = vsel %vm161_vm1, %v283_v55, %v290_v56 }
 0x1bc   :  { %v293_v58 = vsel %vm292_vm4, %v291_v57, 0.0 }
 0x1bd   :  { %294 = vst [vmem:[#allocation2] sm:$0xff] %v293_v58 }
 0x1be   :  { %410 = shalt.err (!%p407_p4)
}
 0x1bf   :  { %304 = dma.vmem_to_hbm [thread:$0]  %s302_s4, 128, %s518_s5, [#allocation3]  }
 0x1c0   :  { %419 = dma.done.wait [#allocation3], 128  }
 0x1c1   :  { %420 = vsyncadd [#allocation3], 4294967168 }
 0x1c2   :  { %308 = vsyncpa [#allocation3], 1 }

</bundles_post_ra>
